<compile_context>
chip_gen: v5e
topology: v5e:2x2
jax: 0.10.0
libtpu: 0.0.40
codegen_flags: <defaults>
</compile_context>

<pallas_src>
import functools

import jax
import jax.numpy as jnp
from jax.experimental import pallas as pl
from jax.experimental.pallas import tpu as pltpu

LN_EPS = 1e-5
_MIB = 1024 * 1024
_HID_CHUNK = 2048                 # d_hid columns per inner-loop step (big MLPs)
_SINGLE_BUF_MIN_BYTES = 4 * _MIB  # single-buffer resident weights above this


def _round_up(n, m):
    return ((n + m - 1) // m) * m


def _const_spec(shape, single_buffer):
    """BlockSpec for a grid-invariant (resident) operand."""
    index_map = lambda i: (0,) * len(shape)
    if single_buffer and hasattr(pl, "Buffered"):
        # Constant index_map => the second pipeline buffer is pure VMEM waste.
        try:
            return pl.BlockSpec(shape, index_map, pipeline_mode=pl.Buffered(1))
        except TypeError:  # older jax without pipeline_mode kwarg
            pass
    return pl.BlockSpec(shape, index_map)


def _ffn_kernel(x_ref, w1t_ref, b1_ref, w2t_ref, b2_ref, g_ref, beta_ref,
                o_ref, *, d_valid, mxu_dtype, hid_chunks):
    # x_ref: (tm, d_valid) token tile; weights are full resident blocks in
    # native MXU (K, N) layout.
    x_in = x_ref[...]
    x_mxu = x_in if x_in.dtype == mxu_dtype else x_in.astype(mxu_dtype)
    x_f32 = x_in.astype(jnp.float32)          # residual / LayerNorm path only

    tm = x_in.shape[0]
    h_pad = w1t_ref.shape[1]
    d_pad = w2t_ref.shape[1]

    # Hoisted (read once) bias / affine rows, in f32.
    b2 = b2_ref[...].astype(jnp.float32)      # (1, D_pad)
    g = g_ref[...].astype(jnp.float32)        # (1, D_pad)
    beta = beta_ref[...].astype(jnp.float32)  # (1, D_pad)

    if hid_chunks == 1:
        b1 = b1_ref[...].astype(jnp.float32)  # (1, H_pad)
        h = jnp.dot(x_mxu, w1t_ref[...], preferred_element_type=jnp.float32)
        h = jnp.maximum(h + b1, 0.0)
        y = jnp.dot(h.astype(mxu_dtype), w2t_ref[...],
                    preferred_element_type=jnp.float32)
    else:
        # Chunk d_hid to bound the live (tm, chunk) f32 intermediate.
        chunk = h_pad // hid_chunks

        def body(c, acc):
            off = pl.multiple_of(c * chunk, 128)
            hc = jnp.dot(x_mxu, w1t_ref[:, pl.ds(off, chunk)],
                         preferred_element_type=jnp.float32)
            hc = hc + b1_ref[:, pl.ds(off, chunk)].astype(jnp.float32)
            hc = jnp.maximum(hc, 0.0)
            return acc + jnp.dot(hc.astype(mxu_dtype),
                                 w2t_ref[pl.ds(off, chunk), :],
                                 preferred_element_type=jnp.float32)

        y = jax.lax.fori_loop(0, hid_chunks, body,
                              jnp.zeros((tm, d_pad), jnp.float32),
                              unroll=hid_chunks <= 4)

    # Residual.  Padded feature columns (if any) stay exactly zero: padded W2
    # columns, padded b2 entries and the zero-extension of x are all zero.
    if d_pad != d_valid:
        x_res = jnp.concatenate(
            [x_f32, jnp.zeros((tm, d_pad - d_valid), jnp.float32)], axis=-1)
    else:
        x_res = x_f32
    y = y + b2 + x_res

    # One-pass LayerNorm statistics over the real width d_valid (padded
    # columns of y are zero, so sums over d_pad equal sums over d_valid).
    inv_d = jnp.float32(1.0 / d_valid)
    mean = jnp.sum(y, axis=-1, keepdims=True) * inv_d
    var = jnp.maximum(
        jnp.sum(y * y, axis=-1, keepdims=True) * inv_d - mean * mean, 0.0)
    out = (y - mean) * jax.lax.rsqrt(var + LN_EPS) * g + beta

    o_ref[...] = out.astype(o_ref.dtype)


@functools.partial(jax.jit, static_argnames=("tm", "use_bf16_matmul"))
def positionwise_ffn(x, w1, b1, w2, b2, gamma, beta, *, tm=512,
                     use_bf16_matmul=False):
    """x: (B, L, d_in).  w1: (d_hid, d_in), b1: (d_hid,), w2: (d_in, d_hid),
    b2: (d_in,), gamma/beta: (d_in,).  Returns (B, L, d_in)."""
    B, L, d_in = x.shape
    d_hid = w1.shape[0]
    M = B * L

    # MXU operand dtype: bf16 inputs -> bf16 matmuls (f32 accumulate); f32
    # inputs stay f32 unless the caller opts into bf16 compute.
    if x.dtype == jnp.bfloat16 or use_bf16_matmul:
        mxu_dtype = jnp.bfloat16
    else:
        mxu_dtype = jnp.float32
    mxu_bytes = jnp.dtype(mxu_dtype).itemsize
    x_bytes = jnp.dtype(x.dtype).itemsize

    # Lane-dense channel padding for weights / output (no-op when channels are
    # already multiples of 128).
    D_pad = _round_up(d_in, 128)
    H_pad = _round_up(d_hid, 128)

    # Weights transposed ONCE in the wrapper so the kernel feeds the MXU in
    # native (K, N) layout; padded channels are zero.
    w1t = jnp.pad(w1.T, ((0, 0), (0, H_pad - d_hid))).astype(mxu_dtype)
    w2t = jnp.pad(w2.T, ((0, H_pad - d_hid), (0, D_pad - d_in))).astype(mxu_dtype)
    b1p = jnp.pad(b1, (0, H_pad - d_hid)).astype(jnp.float32).reshape(1, H_pad)
    b2p = jnp.pad(b2, (0, D_pad - d_in)).astype(jnp.float32).reshape(1, D_pad)
    g2 = jnp.pad(gamma, (0, D_pad - d_in)).astype(jnp.float32).reshape(1, D_pad)
    bt2 = jnp.pad(beta, (0, D_pad - d_in)).astype(jnp.float32).reshape(1, D_pad)

    # Activations are NOT padded in HBM (that would be a full extra read+write
    # of the whole activation tensor); the x tile is zero-extended in-kernel
    # only when d_in % 128 != 0.
    x2 = x.reshape(M, d_in)

    # d_hid chunking only for very wide MLPs (bounds the live f32 intermediate
    # on v7x's 64 MiB VMEM); single shot otherwise.
    if H_pad > _HID_CHUNK and H_pad % _HID_CHUNK == 0:
        hid_chunks = H_pad // _HID_CHUNK
    else:
        hid_chunks = 1
    live_hid = H_pad // hid_chunks

    # Resident-weight bytes; single-buffer them only when it saves real VMEM.
    w_bytes = (d_in * H_pad + H_pad * D_pad) * mxu_bytes + (H_pad + 3 * D_pad) * 4
    single_buffer = w_bytes > _SINGLE_BUF_MIN_BYTES
    w_bufs = 1 if single_buffer else 2

    # Physical VMEM is generation dependent (128 MiB v5e/v6e, 64 MiB v7x);
    # leave headroom for Mosaic internal scratch.
    try:
        phys_vmem = pltpu.get_tpu_info().vmem_capacity_bytes
    except Exception:  # conservative (v7x-sized) fallback
        phys_vmem = 64 * _MIB
    vmem_budget = phys_vmem - 8 * _MIB

    def footprint(tm_):
        tiles = 2 * tm_ * d_in * x_bytes + 2 * tm_ * D_pad * x_bytes  # dbl-buffered I/O
        live = tm_ * (3 * D_pad + live_hid) * 4                       # f32 intermediates
        return tiles + live + w_bufs * w_bytes

    # Token tile: big (amortizes per-grid-step overhead, streams more LHS rows
    # per MXU weight push), clamped to the problem and the VMEM budget, and
    # split so the "parallel" axis has >= 2 steps (v7x has 2 TensorCores).
    tm_eff = min(_round_up(tm, 8), _round_up(M, 8))
    if M > 8 and pl.cdiv(M, tm_eff) < 2:
        tm_eff = _round_up(pl.cdiv(M, 2), 8)
    while tm_eff > 8 and footprint(tm_eff) > vmem_budget:
        tm_eff = max(8, _round_up(tm_eff // 2, 8))
    grid = (pl.cdiv(M, tm_eff),)

    vmem_limit = int(min(vmem_budget, max(2 * footprint(tm_eff), 32 * _MIB)))

    kernel = functools.partial(_ffn_kernel, d_valid=d_in, mxu_dtype=mxu_dtype,
                               hid_chunks=hid_chunks)

    cost = pl.CostEstimate(
        flops=4 * M * d_in * d_hid,
        transcendentals=M,
        bytes_accessed=M * d_in * x_bytes + M * D_pad * x_bytes + w_bytes,
    )

    out = pl.pallas_call(
        kernel,
        out_shape=jax.ShapeDtypeStruct((M, D_pad), x.dtype),
        grid_spec=pltpu.PrefetchScalarGridSpec(
            num_scalar_prefetch=0,
            grid=grid,
            in_specs=[
                pl.BlockSpec((tm_eff, d_in), lambda i: (i, 0)),  # x tile (native width)
                _const_spec((d_in, H_pad), single_buffer),       # W1^T (K, N)
                _const_spec((1, H_pad), single_buffer),          # b1
                _const_spec((H_pad, D_pad), single_buffer),      # W2^T (K, N)
                _const_spec((1, D_pad), single_buffer),          # b2
                _const_spec((1, D_pad), single_buffer),          # gamma
                _const_spec((1, D_pad), single_buffer),          # beta
            ],
            out_specs=pl.BlockSpec((tm_eff, D_pad), lambda i: (i, 0)),
        ),
        compiler_params=pltpu.CompilerParams(
            dimension_semantics=("parallel",),
            vmem_limit_bytes=vmem_limit,
        ),
        cost_estimate=cost,
    )(x2, w1t, b1p, w2t, b2p, g2, bt2)

    if D_pad != d_in:
        out = out[:, :d_in]
    return out.reshape(B, L, d_in)


def _reference(x, w1, b1, w2, b2, gamma, beta):
    # Pure-JAX reference mirroring the PyTorch forward (dropout = identity).
    h = jnp.maximum(jnp.einsum("bld,hd->blh", x, w1) + b1, 0.0)
    y = jnp.einsum("blh,dh->bld", h, w2) + b2
    y = y + x
    mean = jnp.mean(y, axis=-1, keepdims=True)
    var = jnp.mean((y - mean) ** 2, axis=-1, keepdims=True)
    return (y - mean) / jnp.sqrt(var + LN_EPS) * gamma + beta


if __name__ == "__main__":
    B, L, d_in, d_hid = 2, 12, 32, 64   # M=24 -> 2 grid steps incl. a partial block

    key = jax.random.PRNGKey(0)
    kx, k1, kb1, k2, kb2, kg, kbeta = jax.random.split(key, 7)

    x = jax.random.normal(kx, (B, L, d_in), dtype=jnp.float32)

    # Conv1d(d_in, d_hid, 1).weight has shape (d_hid, d_in, 1); drop the k=1 dim.
    w1 = jax.random.normal(k1, (d_hid, d_in), dtype=jnp.float32) * (1.0 / d_in) ** 0.5
    b1 = jax.random.normal(kb1, (d_hid,), dtype=jnp.float32) * 0.01
    w2 = jax.random.normal(k2, (d_in, d_hid), dtype=jnp.float32) * (1.0 / d_hid) ** 0.5
    b2 = jax.random.normal(kb2, (d_in,), dtype=jnp.float32) * 0.01

    # LayerNorm affine params (perturbed so the affine path is exercised).
    gamma = 1.0 + 0.1 * jax.random.normal(kg, (d_in,), dtype=jnp.float32)
    beta = 0.1 * jax.random.normal(kbeta, (d_in,), dtype=jnp.float32)

    out = positionwise_ffn(x, w1, b1, w2, b2, gamma, beta)
    out = jax.block_until_ready(out)

    ref = _reference(x, w1, b1, w2, b2, gamma, beta)
    assert out.shape == (B, L, d_in)
    assert jnp.allclose(out, ref, atol=1e-4, rtol=1e-4), "mismatch vs reference"

    print("KERNEL_OK")
</pallas_src>

<mosaic_0001>
module attributes {stable_mosaic.version = 11 : i64} {
  func.func @_ffn_kernel(%arg0: i32, %arg1: memref<16x32xf32, #tpu.memory_space<vmem>>, %arg2: memref<32x128xf32, #tpu.memory_space<vmem>>, %arg3: memref<1x128xf32, #tpu.memory_space<vmem>>, %arg4: memref<128x128xf32, #tpu.memory_space<vmem>>, %arg5: memref<1x128xf32, #tpu.memory_space<vmem>>, %arg6: memref<1x128xf32, #tpu.memory_space<vmem>>, %arg7: memref<1x128xf32, #tpu.memory_space<vmem>>, %arg8: memref<16x128xf32, #tpu.memory_space<vmem>>) attributes {dimension_semantics = [#tpu.dimension_semantics<parallel>], iteration_bounds = array<i64: 2>, scalar_prefetch = 0 : i64, scratch_operands = 0 : i64, tpu.core_type = #tpu.core_type<tc>, window_params = [{transform_indices = @transform_0, window_bounds = array<i64: 16, 32>}, {pipeline_mode = #tpu.pipeline_mode<synchronous>, transform_indices = @transform_1, window_bounds = array<i64: 32, 128>}, {pipeline_mode = #tpu.pipeline_mode<synchronous>, transform_indices = @transform_2, window_bounds = array<i64: 1, 128>}, {pipeline_mode = #tpu.pipeline_mode<synchronous>, transform_indices = @transform_3, window_bounds = array<i64: 128, 128>}, {pipeline_mode = #tpu.pipeline_mode<synchronous>, transform_indices = @transform_4, window_bounds = array<i64: 1, 128>}, {pipeline_mode = #tpu.pipeline_mode<synchronous>, transform_indices = @transform_5, window_bounds = array<i64: 1, 128>}, {pipeline_mode = #tpu.pipeline_mode<synchronous>, transform_indices = @transform_6, window_bounds = array<i64: 1, 128>}, {transform_indices = @transform_7, window_bounds = array<i64: 16, 128>}]} {
    %c0 = arith.constant 0 : index
    %c0_0 = arith.constant 0 : index
    %0 = vector.load %arg1[%c0, %c0_0] : memref<16x32xf32, #tpu.memory_space<vmem>>, vector<16x32xf32>
    %c0_1 = arith.constant 0 : index
    %c0_2 = arith.constant 0 : index
    %1 = vector.load %arg5[%c0_1, %c0_2] : memref<1x128xf32, #tpu.memory_space<vmem>>, vector<1x128xf32>
    %c0_3 = arith.constant 0 : index
    %c0_4 = arith.constant 0 : index
    %2 = vector.load %arg6[%c0_3, %c0_4] : memref<1x128xf32, #tpu.memory_space<vmem>>, vector<1x128xf32>
    %c0_5 = arith.constant 0 : index
    %c0_6 = arith.constant 0 : index
    %3 = vector.load %arg7[%c0_5, %c0_6] : memref<1x128xf32, #tpu.memory_space<vmem>>, vector<1x128xf32>
    %c0_7 = arith.constant 0 : index
    %c0_8 = arith.constant 0 : index
    %4 = vector.load %arg3[%c0_7, %c0_8] : memref<1x128xf32, #tpu.memory_space<vmem>>, vector<1x128xf32>
    %c0_9 = arith.constant 0 : index
    %c0_10 = arith.constant 0 : index
    %5 = vector.load %arg2[%c0_9, %c0_10] : memref<32x128xf32, #tpu.memory_space<vmem>>, vector<32x128xf32>
    %cst = arith.constant dense<0.000000e+00> : vector<16x128xf32>
    %6 = tpu.matmul %0, %5, %cst {dimension_numbers = #tpu.dot_dimension_numbers<[1], [0], [0], [1], [0, 0, 1, 1], [], []>} : vector<16x32xf32>, vector<32x128xf32>, vector<16x128xf32> -> vector<16x128xf32>
    %7 = vector.broadcast %4 : vector<1x128xf32> to vector<16x128xf32>
    %8 = arith.addf %6, %7 : vector<16x128xf32>
    %cst_11 = arith.constant 0.000000e+00 : f32
    %9 = vector.broadcast %cst_11 : f32 to vector<16x128xf32>
    %10 = arith.maximumf %8, %9 : vector<16x128xf32>
    %c0_12 = arith.constant 0 : index
    %c0_13 = arith.constant 0 : index
    %11 = vector.load %arg4[%c0_12, %c0_13] : memref<128x128xf32, #tpu.memory_space<vmem>>, vector<128x128xf32>
    %cst_14 = arith.constant dense<0.000000e+00> : vector<16x128xf32>
    %12 = tpu.matmul %10, %11, %cst_14 {dimension_numbers = #tpu.dot_dimension_numbers<[1], [0], [0], [1], [0, 0, 1, 1], [], []>} : vector<16x128xf32>, vector<128x128xf32>, vector<16x128xf32> -> vector<16x128xf32>
    %cst_15 = arith.constant 0.000000e+00 : f32
    %13 = vector.broadcast %cst_15 : f32 to vector<16x96xf32>
    %14 = tpu.concatenate %0, %13 in 1 : vector<16x32xf32>, vector<16x96xf32> -> vector<16x128xf32>
    %15 = vector.broadcast %1 : vector<1x128xf32> to vector<16x128xf32>
    %16 = arith.addf %12, %15 : vector<16x128xf32>
    %17 = arith.addf %16, %14 : vector<16x128xf32>
    %cst_16 = arith.constant dense<0.000000e+00> : vector<16xf32>
    %18 = vector.multi_reduction <add>, %17, %cst_16 [1] : vector<16x128xf32> to vector<16xf32>
    %19 = vector.shape_cast %18 : vector<16xf32> to vector<16x1xf32>
    %cst_17 = arith.constant 3.125000e-02 : f32
    %20 = vector.broadcast %cst_17 : f32 to vector<16x1xf32>
    %21 = arith.mulf %19, %20 : vector<16x1xf32>
    %22 = arith.mulf %17, %17 : vector<16x128xf32>
    %cst_18 = arith.constant dense<0.000000e+00> : vector<16xf32>
    %23 = vector.multi_reduction <add>, %22, %cst_18 [1] : vector<16x128xf32> to vector<16xf32>
    %24 = vector.shape_cast %23 : vector<16xf32> to vector<16x1xf32>
    %cst_19 = arith.constant 3.125000e-02 : f32
    %25 = vector.broadcast %cst_19 : f32 to vector<16x1xf32>
    %26 = arith.mulf %24, %25 : vector<16x1xf32>
    %27 = arith.mulf %21, %21 : vector<16x1xf32>
    %28 = arith.subf %26, %27 : vector<16x1xf32>
    %cst_20 = arith.constant 0.000000e+00 : f32
    %29 = vector.broadcast %cst_20 : f32 to vector<16x1xf32>
    %30 = arith.maximumf %28, %29 : vector<16x1xf32>
    %31 = vector.broadcast %21 : vector<16x1xf32> to vector<16x128xf32>
    %32 = arith.subf %17, %31 : vector<16x128xf32>
    %cst_21 = arith.constant 9.99999974E-6 : f32
    %33 = vector.broadcast %cst_21 : f32 to vector<16x1xf32>
    %34 = arith.addf %30, %33 : vector<16x1xf32>
    %35 = math.rsqrt %34 : vector<16x1xf32>
    %36 = vector.broadcast %35 : vector<16x1xf32> to vector<16x128xf32>
    %37 = arith.mulf %32, %36 : vector<16x128xf32>
    %38 = vector.broadcast %2 : vector<1x128xf32> to vector<16x128xf32>
    %39 = arith.mulf %37, %38 : vector<16x128xf32>
    %40 = vector.broadcast %3 : vector<1x128xf32> to vector<16x128xf32>
    %41 = arith.addf %39, %40 : vector<16x128xf32>
    %c0_22 = arith.constant 0 : index
    %c0_23 = arith.constant 0 : index
    %42 = vector.load %arg8[%c0_22, %c0_23] : memref<16x128xf32, #tpu.memory_space<vmem>>, vector<16x128xf32>
    tpu.vector_store %arg8[%c0_22, %c0_23], %41 {strides = array<i32>} : memref<16x128xf32, #tpu.memory_space<vmem>>, vector<16x128xf32>,
    return
  }
  func.func @transform_0(%arg0: i32) -> (i32, i32) {
    %c0_i32 = arith.constant 0 : i32
    %c0_i32_0 = arith.constant 0 : i32
    return %arg0, %c0_i32 : i32, i32
  }
  func.func @transform_1(%arg0: i32) -> (i32, i32) {
    %c0_i32 = arith.constant 0 : i32
    %c0_i32_0 = arith.constant 0 : i32
    %c0_i32_1 = arith.constant 0 : i32
    return %c0_i32, %c0_i32_0 : i32, i32
  }
  func.func @transform_2(%arg0: i32) -> (i32, i32) {
    %c0_i32 = arith.constant 0 : i32
    %c0_i32_0 = arith.constant 0 : i32
    %c0_i32_1 = arith.constant 0 : i32
    return %c0_i32, %c0_i32_0 : i32, i32
  }
  func.func @transform_3(%arg0: i32) -> (i32, i32) {
    %c0_i32 = arith.constant 0 : i32
    %c0_i32_0 = arith.constant 0 : i32
    %c0_i32_1 = arith.constant 0 : i32
    return %c0_i32, %c0_i32_0 : i32, i32
  }
  func.func @transform_4(%arg0: i32) -> (i32, i32) {
    %c0_i32 = arith.constant 0 : i32
    %c0_i32_0 = arith.constant 0 : i32
    %c0_i32_1 = arith.constant 0 : i32
    return %c0_i32, %c0_i32_0 : i32, i32
  }
  func.func @transform_5(%arg0: i32) -> (i32, i32) {
    %c0_i32 = arith.constant 0 : i32
    %c0_i32_0 = arith.constant 0 : i32
    %c0_i32_1 = arith.constant 0 : i32
    return %c0_i32, %c0_i32_0 : i32, i32
  }
  func.func @transform_6(%arg0: i32) -> (i32, i32) {
    %c0_i32 = arith.constant 0 : i32
    %c0_i32_0 = arith.constant 0 : i32
    %c0_i32_1 = arith.constant 0 : i32
    return %c0_i32, %c0_i32_0 : i32, i32
  }
  func.func @transform_7(%arg0: i32) -> (i32, i32) {
    %c0_i32 = arith.constant 0 : i32
    %c0_i32_0 = arith.constant 0 : i32
    return %arg0, %c0_i32 : i32, i32
  }
}

</mosaic_0001>

<bundles_post_ra>
// kernel: positionwise_ffn.1
= control target key start
LH: loop header
LB: loop body
LE: loop exit
PB: predicated region body
PF: predicated region fallthrough
CT: control target
= control target key end

     0   :  { %s938_s24 = smov 0   ;;  %s940_s25 = smov 0   ;;  %s1097_s0 = inlined_call_operand.vmem [shape: f32[24,32], index: 0, kind: input, shape index: {}]   ;;  %s1098_s1 = inlined_call_operand.vmem [shape: f32[32,128], index: 1, kind: input, shape index: {}]   ;;  %s1099_s2 = inlined_call_operand.vmem [shape: f32[1,128], index: 2, kind: input, shape index: {}]   ;;  %s1100_s3 = inlined_call_operand.vmem [shape: f32[128,128], index: 3, kind: input, shape index: {}]   ;;  %s1101_s4 = inlined_call_operand.vmem [shape: f32[1,128], index: 4, kind: input, shape index: {}]   ;;  %s1102_s5 = inlined_call_operand.vmem [shape: f32[1,128], index: 5, kind: input, shape index: {}]   ;;  %s1103_s6 = inlined_call_operand.vmem [shape: f32[1,128], index: 6, kind: input, shape index: {}]   ;;  %s1104_s7 = inlined_call_operand.vmem [shape: f32[24,128], index: 7, kind: output, shape index: {}]  }
   0x1   :  { %s942_s26 = smov 0  }
   0x2 LB: > { %s951_s27 = sadd.s32 4294967295, %s864_s26   ;;  %s953_s28 = sadd.s32 1, %s864_s26   ;;  %s864_s26 = sphi %s942_s26, %s1108_s26   ;;  %s860_s25 = sphi %s940_s25, %s1107_s25   ;;  %s856_s24 = sphi %s938_s24, %s1106_s24  }
   0x3   : > { %s173_s29 = ssub.s32 %s864_s26, %s953_s28  ;;  %s176_s30 = sadd.s32 1, %s860_s25 }
   0x4   : > { %p174_p0 = scmp.eq.s32.totalorder %s173_s29, 0  ;;  %p186_p1 = scmp.ne.s32.totalorder %s860_s25, %s856_s24 }
   0x5   : > { %p187_p2 = scmp.eq.s32.totalorder %s951_s27, 1  ;;  %p672_p3 = scmp.ge.s32.totalorder %s864_s26, 1 }
   0x6   : > { %s961_s8 = scalar_select %p174_p0, %s860_s25, %s176_s30  }
   0x7   : > { %p963_p4 = por %p187_p2, %p186_p1  ;;  %p246_p5 = scmp.lt.s32.totalorder %s864_s26, 3 }
   0x9   : > { %p247_p6 = pnand %p672_p3, %p246_p5 }
   0xa   : > { %s974_s14 = sshll.u32 (!%p247_p6), %s951_s27, 1  ;;  %s278_s11 = sand.u32 (!%p247_p6), 1, %s856_s24  }
   0xb   : > { %250 = sbr.rel (%p247_p6) target bundleno = 488 (0x1e8), region = 48  ;;  %p286_p7 = scmp.lt.s32.totalorder (!%p247_p6), %s974_s14, 2 }
   0xc   : > { %s673_s17 = sshll.u32 (!%p247_p6), %s278_s11, 4 }
   0xd   : > { %s1052_s24 = scalar_lea.vmem (!%p247_p6), [#allocation2], %s673_s17  }
  0x10   : > { %v309_v0 = vld [vmem:[%s1098_s1 + $0x18] sm:$0xff]  ;;  %v308_v1 = vld [vmem:[%s1098_s1 + $0x10] sm:$0xff]  ;;  %v307_v4 = vld [vmem:[%s1098_s1 + $0x8] sm:$0xff]  ;;  %s287_s21 = scalar_select %p286_p7, %s974_s14, 2  ;;  %vm313_vm0 = vcmask 261120  }
  0x11   : > { %332 = vmatpush.msra.mxu0 %v309_v0  ;;  %v360_v2 = vld [vmem:[%s1100_s3 + $0x78] sm:$0xff]  ;;  %v359_v3 = vld [vmem:[%s1100_s3 + $0x70] sm:$0xff]  ;;  %v358_v5 = vld [vmem:[%s1100_s3 + $0x68] sm:$0xff]  ;;  %s457_s18 = ssub.s32 (%p963_p4), 3, %s974_s14  ;;  %s695_s19 = sshll.u32 (%p963_p4), %s951_s27, 4 }
  0x12   : > { %366 = vmatpush.msra.mxu1 %v360_v2  ;;  %698 = vmatpush.msra.mxu2 %v360_v2  ;;  %v306_v6 = vld [vmem:[%s1098_s1] sm:$0xff]  ;;  %s675_s30 = sshll.u32 %s287_s21, 3  ;;  %v356_v8 = vld [vmem:[%s1100_s3 + $0x58] sm:$0xff]  ;;  %v355_v13 = vld [vmem:[%s1100_s3 + $0x50] sm:$0xff]  ;;  %p458_p8 = scmp.lt.s32.totalorder (%p963_p4), %s457_s18, 2 }
  0x13   : > { %333 = vmatpush.msra.mxu0 %v308_v1  ;;  %v357_v7 = vld [vmem:[%s1100_s3 + $0x60] sm:$0xff]  ;;  %s289_s15 = scalar_lea.vmem %s1097_s0, %s675_s30  ;;  %v354_v14 = vld [vmem:[%s1100_s3 + $0x48] sm:$0xff]  ;;  %v352_v16 = vld [vmem:[%s1100_s3 + $0x38] sm:$0xff]  ;;  %s1063_s22 = scalar_lea.vmem (%p963_p4), %s1104_s7, %s695_s19  }
  0x14   : > { %367 = vmatpush.msra.mxu1 %v359_v3  ;;  %699 = vmatpush.msra.mxu2 %v359_v3  ;;  %v300_v9 = vld [vmem:[%s289_s15] sm:$0xff]  ;;  %v301_v10 = vld [vmem:[%s289_s15 + $0x8] sm:$0xff]  ;;  %v351_v17 = vld [vmem:[%s1100_s3 + $0x30] sm:$0xff] }
  0x15   : > { %334 = vmatpush.msra.mxu0 %v307_v4  ;;  %v361_v11 = vsel %vm313_vm0, %v300_v9, 0.0  ;;  %v362_v12 = vsel %vm313_vm0, %v301_v10, 0.0  ;;  %v353_v15 = vld [vmem:[%s1100_s3 + $0x40] sm:$0xff]  ;;  %v350_v18 = vld [vmem:[%s1100_s3 + $0x28] sm:$0xff]  ;;  %v348_v20 = vld [vmem:[%s1100_s3 + $0x18] sm:$0xff] }
  0x16   : > { %368 = vmatpush.msra.mxu1 %v358_v5  ;;  %700 = vmatpush.msra.mxu2 %v358_v5  ;;  %v349_v19 = vld [vmem:[%s1100_s3 + $0x20] sm:$0xff]  ;;  %v347_v21 = vld [vmem:[%s1100_s3 + $0x10] sm:$0xff]  ;;  %v346_v22 = vld [vmem:[%s1100_s3 + $0x8] sm:$0xff] }
  0x17   : > { %335 = vmatpush.msra.mxu0 %v306_v6  ;;  %v345_v23 = vld [vmem:[%s1100_s3] sm:$0xff] }
  0x18   : > { %676 = vmatmul.msk.f32.vlgmr.msra.gmra.mxu0 %vm313_vm0, %v300_v9  ;;  %369 = vmatpush.msra.mxu1 %v357_v7  ;;  %v802_v24 = vld [vmem:[%s1099_s2] ss:$0 sm:$0xff] }
  0x19   : > { %701 = vmatpush.msra.mxu2 %v357_v7  ;;  %v803_v31 = vld [vmem:[%s1101_s4] ss:$0 sm:$0xff] }
  0x1a   : > { %370 = vmatpush.msra.mxu1 %v356_v8  ;;  %v804_v63 = vld [vmem:[%s1102_s5] ss:$0 sm:$0xff] }
  0x1b   : > { %702 = vmatpush.msra.mxu2 %v356_v8  ;;  %v805_v1 = vld [vmem:[%s1103_s6] ss:$0 sm:$0xff] }
  0x1c   : > { %371 = vmatpush.msra.mxu1 %v355_v13 }
  0x1d   : > { %703 = vmatpush.msra.mxu2 %v355_v13 }
  0x1e   : > { %372 = vmatpush.msra.mxu1 %v354_v14 }
  0x1f   : > { %704 = vmatpush.msra.mxu2 %v354_v14 }
  0x20   : > { %677 = vmatmul.msk.f32.gmra.mxu0 %vm313_vm0, %v301_v10  ;;  %373 = vmatpush.msra.mxu1 %v353_v15 }
  0x21   : > { %705 = vmatpush.msra.mxu2 %v353_v15 }
  0x22   : > { %374 = vmatpush.msra.mxu1 %v352_v16 }
  0x23   : > { %706 = vmatpush.msra.mxu2 %v352_v16 }
  0x24   : > { %375 = vmatpush.msra.mxu1 %v351_v17 }
  0x25   : > { %707 = vmatpush.msra.mxu2 %v351_v17 }
  0x26   : > { %376 = vmatpush.msra.mxu1 %v350_v18 }
  0x27   : > { %708 = vmatpush.msra.mxu2 %v350_v18 }
  0x28   : > { %377 = vmatpush.msra.mxu1 %v349_v19 }
  0x29   : > { %709 = vmatpush.msra.mxu2 %v349_v19 }
  0x2a   : > { %378 = vmatpush.msra.mxu1 %v348_v20 }
  0x2b   : > { %710 = vmatpush.msra.mxu2 %v348_v20 }
  0x2c   : > { %379 = vmatpush.msra.mxu1 %v347_v21 }
  0x2d   : > { %711 = vmatpush.msra.mxu2 %v347_v21 }
  0x2e   : > { %380 = vmatpush.msra.mxu1 %v346_v22 }
  0x2f   : > { %712 = vmatpush.msra.mxu2 %v346_v22 }
  0x30   : > { %381 = vmatpush.msra.mxu1 %v345_v23 }
  0x31   : > { %713 = vmatpush.msra.mxu2 %v345_v23 }
  0x95   : > { %v337_v25 = vpop.f32.mrf.mxu0 }
  0x96   : > { %v338_v26 = vadd.f32 %v802_v24, %v337_v25 }
  0x98   : > { %v343_v27 = vmax.f32 %v338_v26, 0.0 }
  0x9a   : > { %382 = vmatmul.f32.vlgmr.msra.gmra.mxu1 %v343_v27 }
  0x9d   : > { %v340_v28 = vpop.f32.mrf.mxu0 }
  0x9e   : > { %v341_v29 = vadd.f32 %v802_v24, %v340_v28 }
  0xa0   : > { %v344_v30 = vmax.f32 %v341_v29, 0.0 }
  0xa2   : > { %385 = vmatmul.f32.vlgmr.msra.gmra.mxu2 %v344_v30 }
 0x117   : > { %v383_v32 = vpop.f32.mrf.mxu1 }
 0x118   : > { %v384_v33 = vadd.f32 %v803_v31, %v383_v32 }
 0x11a   : > { %v389_v34 = vadd.f32 %v384_v33, %v361_v11 }
 0x11c   : > { %391 = vadd.xlane.f32.xlu0 %v389_v34  ;;  %v397_v35 = vmul.f32 %v389_v34, %v389_v34 }
 0x11e   : > { %399 = vadd.xlane.f32.xlu1 %v397_v35 }
 0x125   : > { %v386_v36 = vpop.f32.mrf.mxu2 }
 0x126   : > { %v387_v37 = vadd.f32 %v803_v31, %v386_v36 }
 0x128   : > { %v390_v38 = vadd.f32 %v387_v37, %v362_v12 }
 0x12a   : > { %393 = vadd.xlane.f32.xlu0 %v390_v38  ;;  %v398_v39 = vmul.f32 %v390_v38, %v390_v38 }
 0x12c   : > { %401 = vadd.xlane.f32.xlu1 %v398_v39 }
 0x18f   : > { %v392_v40 = vpop.xlane.xlu0 %391 }
 0x190   : > { %v395_v41 = vmul.f32 0.03125, %v392_v40 }
 0x191   : > { %v400_v42 = vpop.xlane.xlu1 %399 }
 0x192   : > { %v405_v43 = vmul.f32 %v395_v41, %v395_v41  ;;  %v403_v44 = vmul.f32 0.03125, %v400_v42  ;;  %v411_v62 = vsub.f32 %v389_v34, %v395_v41 }
 0x194   : > { %v407_v45 = vsub.f32 %v403_v44, %v405_v43 }
 0x196   : > { %v409_v46 = vmax.f32 %v407_v45, 0.0 }
 0x198   : > { %v413_v47 = vadd.f32 1e-05, %v409_v46 }
 0x19a   : > { %806 = vrsqrt.f32 %v413_v47  ;;  %vm421_vm2 = vweird.f32 %v413_v47 }
 0x19d   : > { %v394_v48 = vpop.xlane.xlu0 %393 }
 0x19e   : > { %v396_v49 = vmul.f32 0.03125, %v394_v48 }
 0x19f   : > { %v402_v50 = vpop.xlane.xlu1 %401 }
 0x1a0   : > { %v807_v51 = vpop.eup %806  ;;  %v406_v52 = vmul.f32 %v396_v49, %v396_v49  ;;  %v404_v53 = vmul.f32 0.03125, %v402_v50  ;;  %v412_v11 = vsub.f32 %v390_v38, %v396_v49 }
 0x1a1   : > { %v416_v54 = vmul.f32 %v807_v51, %v413_v47  ;;  %vm422_vm1 = vweird.f32 %v807_v51 }
 0x1a2   : > { %v408_v55 = vsub.f32 %v404_v53, %v406_v52  ;;  %vm423_vm3 = vmor %vm421_vm2, %vm422_vm1 }
 0x1a3   : > { %v417_v56 = vmul.f32 %v807_v51, %v416_v54 }
 0x1a4   : > { %v410_v57 = vmax.f32 %v408_v55, 0.0 }
 0x1a5   : > { %v418_v58 = vmul.f32 0.5, %v417_v56 }
 0x1a6   : > { %v414_v59 = vadd.f32 1e-05, %v410_v57 }
 0x1a7   : > { %v419_v60 = vsub.f32 1.5, %v418_v58 }
 0x1a8   : > { %808 = vrsqrt.f32 %v414_v59  ;;  %vm431_vm5 = vweird.f32 %v414_v59 }
 0x1a9   : > { %v420_v61 = vmul.f32 %v807_v51, %v419_v60 }
 0x1ab   : > { %v424_v0 = vsel %vm423_vm3, %v807_v51, %v420_v61 }
 0x1ac   : > { %v435_v2 = vmul.f32 %v424_v0, %v411_v62 }
 0x1ae   : > { %v809_v3 = vpop.eup %808  ;;  %v440_v4 = vmul.f32 %v804_v63, %v435_v2 }
 0x1af   : > { %v426_v5 = vmul.f32 %v809_v3, %v414_v59  ;;  %vm432_vm4 = vweird.f32 %v809_v3 }
 0x1b0   : > { %v445_v6 = vadd.f32 %v805_v1, %v440_v4  ;;  %vm433_vm6 = vmor %vm431_vm5, %vm432_vm4 }
 0x1b1   : > { %v427_v7 = vmul.f32 %v809_v3, %v426_v5 }
 0x1b2   : > { %447 = vst [vmem:[%s1052_s24] sm:$0xff] %v445_v6 }
 0x1b3   : > { %v428_v8 = vmul.f32 0.5, %v427_v7 }
 0x1b5   : > { %v429_v9 = vsub.f32 1.5, %v428_v8 }
 0x1b7   : > { %v430_v10 = vmul.f32 %v809_v3, %v429_v9 }
 0x1b9   : > { %v434_v12 = vsel %vm433_vm6, %v809_v3, %v430_v10 }
 0x1ba   : > { %v436_v13 = vmul.f32 %v434_v12, %v412_v11 }
 0x1bc   : > { %v441_v14 = vmul.f32 %v804_v63, %v436_v13  ;;  %455 = sbr.rel (!%p963_p4) target bundleno = 488 (0x1e8), region = 52 }
 0x1be   : > { %v446_v15 = vadd.f32 %v805_v1, %v441_v14 }
 0x1c0   : > { %448 = vst [vmem:[%s1052_s24 + $0x8] sm:$0xff] %v446_v15 }
 0x1c1   : > { %s1110_s18 = smov (!%p458_p8, %s457_s18), 2 }
 0x1c2   : > { %s680_s23 = sshll.u32 %s1110_s18, 3 }
 0x1c3   : > { %p683_p9 = scmp.eq.s32.totalorder %s680_s23, 0 }
 0x1c4   : > { %s1069_s26 = sshrl.u32 (!%p683_p9), %s1110_s18, 1 }
 0x1c5   : > { %466 = sbr.rel (%p683_p9) target bundleno = 488 (0x1e8), region = 56  ;;  %p684_p10 = scmp.le.s32.totalorder (!%p683_p9), %s1069_s26, 0 }
 0x1ca   : > { %625 = sbr.rel (%p684_p10) target bundleno = 471 (0x1d7), region = 132  ;;  %s866_s27 = smov (!%p684_p10), %s1063_s22  }
 0x1cb   : > { %s870_s9 = smov (!%p684_p10), %s1052_s24   ;;  %s874_s14 = smov (!%p684_p10), 0  }
 0x1cc   : > { %s878_s29 = smov (!%p684_p10), 0  }
 0x1cf LB: >> { %v531_v16 = vld [vmem:[%s872_s9] sm:$0xff]  ;;  %v533_v17 = vld [vmem:[%s872_s9 + $0x8] sm:$0xff]  ;;  %s535_s30 = sadd.s32 1, %s876_s14  ;;  %s525_s29 = sadd.s32 1, %s880_s29   ;;  %s880_s29 = sphi %s878_s29, %s525_s29   ;;  %s876_s14 = sphi %s874_s14, %s875_s14   ;;  %s872_s9 = sphi %s870_s9, %s540_s9   ;;  %s868_s27 = sphi %s866_s27, %s541_s27  }
 0x1d0   : >> { %532 = vst [vmem:[%s868_s27] sm:$0xff] %v531_v16  ;;  %p536_p11 = scmp.ge.s32.totalorder %s535_s30, %s1069_s26  ;;  %p524_p12 = scmp.ge.s32.totalorder %s525_s29, %s1069_s26 }
 0x1d1   : >> { %534 = vst [vmem:[%s868_s27 + $0x8] sm:$0xff] %v533_v17 }
 0x1d2   : >> { %s1112_s30 = smov (%p536_p11, %s535_s30), 0  ;;  %527 = sbr.rel (!%p524_p12) target bundleno = 463 (0x1cf), region = 138 }
 0x1d3   : >> { %s685_s10 = sshll.u32 %s1112_s30, 4  ;;  %s875_s14 = smov %s1112_s30  }
 0x1d4   : >> { %s540_s9 = scalar_lea.vmem %s1052_s24, %s685_s10 [#allocation2]   ;;  %s541_s27 = scalar_lea.vmem %s1063_s22, %s685_s10  }
 0x1d7 PF: > { %s1079_s11 = sand.u32 1, %s1110_s18   ;;  %s696_s12 = sshll.u32 %s1069_s26, 4 }
 0x1d8   : > { %s546_s13 = scalar_lea.vmem %s1052_s24, %s696_s12 [#allocation2]   ;;  %s548_s15 = scalar_lea.vmem %s1063_s22, %s696_s12  }
 0x1d9   : > { %p690_p13 = scmp.le.s32.totalorder %s1079_s11, 0 }
 0x1da   : > { %s882_s16 = smov (!%p690_p13), %s548_s15   ;;  %s886_s17 = smov (!%p690_p13), %s546_s13  }
 0x1db   : > { %639 = sbr.rel (%p690_p13) target bundleno = 488 (0x1e8), region = 143  ;;  %s890_s19 = smov (!%p690_p13), 0  }
 0x1dc   : > { %s894_s20 = smov (!%p690_p13), 0  }
 0x1e0 LB: >> { %v558_v18 = vld [vmem:[%s888_s17] sm:$0xff]  ;;  %s560_s18 = sadd.s32 1, %s892_s19  ;;  %s552_s20 = sadd.s32 1, %s896_s20   ;;  %s896_s20 = sphi %s894_s20, %s552_s20   ;;  %s892_s19 = sphi %s890_s19, %s891_s19   ;;  %s888_s17 = sphi %s886_s17, %s565_s17   ;;  %s884_s16 = sphi %s882_s16, %s566_s16  }
 0x1e1   : >> { %559 = vst [vmem:[%s884_s16] sm:$0xff] %v558_v18  ;;  %p561_p0 = scmp.ge.s32.totalorder %s560_s18, %s1079_s11  ;;  %p551_p1 = scmp.ge.s32.totalorder %s552_s20, %s1079_s11 }
 0x1e3   : >> { %s1114_s18 = smov (%p561_p0, %s560_s18), 0  ;;  %554 = sbr.rel (!%p551_p1) target bundleno = 480 (0x1e0), region = 149 }
 0x1e4   : >> { %s691_s24 = sshll.u32 %s1114_s18, 3  ;;  %s891_s19 = smov %s1114_s18  }
 0x1e5   : >> { %s565_s17 = scalar_lea.vmem %s546_s13, %s691_s24 [#allocation2]   ;;  %s566_s16 = scalar_lea.vmem %s548_s15, %s691_s24  }
 0x1e8 PF: > { %p14_p2 = scmp.ge.s32.totalorder %s953_s28, 4   ;;  %s1106_s24 = smov %s860_s25 }
 0x1e9   : > { %s1107_s25 = smov %s961_s8  ;;  %s1108_s26 = smov %s953_s28 }
 0x1ea   :  { %16 = sbr.rel (!%p14_p2) target bundleno = 2 (0x2), region = 160 }

</bundles_post_ra>
